<compile_context>
chip_gen: v5e
topology: v5e:2x2
jax: 0.10.0
libtpu: 0.0.40
codegen_flags: <defaults>
</compile_context>

<pallas_src>
import jax
import jax.numpy as jnp
from jax import lax
from jax.experimental import pallas as pl
from jax.experimental.pallas import tpu as pltpu


def time_embedding_kernel(x_ref, w1_ref, b1_ref, w2_ref, b2_ref, o_ref):
    # ---- Layer 1: (B, n) @ W1(out,in)^T -> (B, 4n), f32 accumulation.
    # Recomputed per W2 tile: trivial FLOPs, keeps grid steps independent.
    xv = x_ref[...].astype(w1_ref.dtype)
    h = lax.dot_general(
        xv, w1_ref[...],
        dimension_numbers=(((1,), (1,)), ((), ())),   # contract in-features
        preferred_element_type=jnp.float32)
    h = h + b1_ref[...]
    # SiLU on the f32 accumulator (EUP sigmoid + VPU mul).
    h = h * jax.nn.sigmoid(h)

    # ---- Layer 2 tile: (B, 4n) @ W2[tile_rows, :]^T -> (B, tn).
    # h is downcast to the weight dtype (bf16) before the MXU matmul;
    # accumulation stays f32 (acceptable precision for time embeddings).
    out = lax.dot_general(
        h.astype(w2_ref.dtype), w2_ref[...],
        dimension_numbers=(((1,), (1,)), ((), ())),
        preferred_element_type=jnp.float32)
    out = out + b2_ref[...]
    o_ref[...] = out.astype(o_ref.dtype)


def _pick_out_tile(n_hidden, max_tile=512):
    """Largest multiple of 128 that divides n_hidden and is <= max_tile."""
    if n_hidden % 128 != 0:
        return n_hidden                    # fall back to a single full block
    best = 128
    for cand in range(128, max_tile + 1, 128):
        if n_hidden % cand == 0:
            best = cand
    return best


def time_embedding(x, w1, b1, w2, b2, *, out_dtype=None):
    """x: (B, n_embd); w1: (4n, n) [PyTorch layout]; b1: (4n,);
    w2: (4n, 4n) [PyTorch layout]; b2: (4n,). Returns (B, 4n)."""
    B, n_embd = x.shape
    n_hidden = w1.shape[0]
    assert w1.shape == (n_hidden, n_embd), w1.shape
    assert w2.shape == (n_hidden, n_hidden), w2.shape
    out_dtype = out_dtype or x.dtype

    # Biases are tiny: keep/add them in f32, shaped 2-D for VMEM.
    b1_2d = b1.reshape(1, n_hidden).astype(jnp.float32)
    b2_2d = b2.reshape(1, n_hidden).astype(jnp.float32)

    tn = _pick_out_tile(n_hidden)
    num_tiles = n_hidden // tn

    itemsize = lambda a: int(a.size) * int(jnp.dtype(a.dtype).itemsize)
    cost = pl.CostEstimate(
        flops=2 * B * (n_embd * n_hidden + n_hidden * n_hidden),
        transcendentals=B * n_hidden,
        bytes_accessed=(itemsize(x) + itemsize(w1) + itemsize(w2)
                        + itemsize(b1_2d) + itemsize(b2_2d)
                        + B * n_hidden * int(jnp.dtype(out_dtype).itemsize)),
    )

    return pl.pallas_call(
        time_embedding_kernel,
        out_shape=jax.ShapeDtypeStruct((B, n_hidden), out_dtype),
        grid_spec=pltpu.PrefetchScalarGridSpec(
            num_scalar_prefetch=0,
            grid=(num_tiles,),
            in_specs=[
                # Resident across the grid (constant block index => single DMA).
                pl.BlockSpec((B, n_embd), lambda j: (0, 0)),
                pl.BlockSpec((n_hidden, n_embd), lambda j: (0, 0)),
                pl.BlockSpec((1, n_hidden), lambda j: (0, 0)),
                # Streamed, double-buffered W2 row-tile + matching bias slice.
                pl.BlockSpec((tn, n_hidden), lambda j: (j, 0)),
                pl.BlockSpec((1, tn), lambda j: (0, j)),
            ],
            out_specs=pl.BlockSpec((B, tn), lambda j: (0, j)),
        ),
        compiler_params=pltpu.CompilerParams(
            dimension_semantics=("parallel",)),
        cost_estimate=cost,
    )(x, w1, b1_2d, w2, b2_2d)


def time_embedding_ref(x, w1, b1, w2, b2):
    h = x @ w1.T + b1
    h = h * jax.nn.sigmoid(h)
    return h @ w2.T + b2


if __name__ == "__main__":
    B = 2
    n_embd = 32
    n_hidden = 4 * n_embd

    key = jax.random.PRNGKey(0)
    kx, k1, k2, k3, k4 = jax.random.split(key, 5)

    x = jax.random.normal(kx, (B, n_embd), dtype=jnp.float32)
    # Deterministic synthetic parameters (shapes from nn.Linear in __init__).
    w1_f32 = jax.random.normal(k1, (n_hidden, n_embd), dtype=jnp.float32) * 0.05
    b1 = jax.random.normal(k2, (n_hidden,), dtype=jnp.float32) * 0.05
    w2_f32 = jax.random.normal(k3, (n_hidden, n_hidden), dtype=jnp.float32) * 0.05
    b2 = jax.random.normal(k4, (n_hidden,), dtype=jnp.float32) * 0.05

    # One-time "parameter-load" cast: weights stored in bf16, PyTorch layout.
    w1 = w1_f32.astype(jnp.bfloat16)
    w2 = w2_f32.astype(jnp.bfloat16)

    out = jax.block_until_ready(time_embedding(x, w1, b1, w2, b2))

    # Reference in f32 using the same bf16-stored weight values.
    ref = time_embedding_ref(x, w1.astype(jnp.float32), b1,
                             w2.astype(jnp.float32), b2)
    assert out.shape == (B, n_hidden), out.shape
    max_err = float(jnp.max(jnp.abs(out - ref)))
    # bf16 weight/activation carry + f32 accumulation: loose-ish tolerance.
    assert jnp.allclose(out, ref, atol=1e-2, rtol=1e-2), max_err

    print("KERNEL_OK")
</pallas_src>

<mosaic_0001>
module attributes {stable_mosaic.version = 11 : i64} {
  func.func @time_embedding_kernel(%arg0: i32, %arg1: memref<2x32xf32, #tpu.memory_space<vmem>>, %arg2: memref<128x32xbf16, #tpu.memory_space<vmem>>, %arg3: memref<1x128xf32, #tpu.memory_space<vmem>>, %arg4: memref<128x128xbf16, #tpu.memory_space<vmem>>, %arg5: memref<1x128xf32, #tpu.memory_space<vmem>>, %arg6: memref<2x128xf32, #tpu.memory_space<vmem>>) attributes {dimension_semantics = [#tpu.dimension_semantics<parallel>], iteration_bounds = array<i64: 1>, scalar_prefetch = 0 : i64, scratch_operands = 0 : i64, tpu.core_type = #tpu.core_type<tc>, window_params = [{pipeline_mode = #tpu.pipeline_mode<synchronous>, transform_indices = @transform_0, window_bounds = array<i64: 2, 32>}, {pipeline_mode = #tpu.pipeline_mode<synchronous>, transform_indices = @transform_1, window_bounds = array<i64: 128, 32>}, {pipeline_mode = #tpu.pipeline_mode<synchronous>, transform_indices = @transform_2, window_bounds = array<i64: 1, 128>}, {transform_indices = @transform_3, window_bounds = array<i64: 128, 128>}, {transform_indices = @transform_4, window_bounds = array<i64: 1, 128>}, {transform_indices = @transform_5, window_bounds = array<i64: 2, 128>}]} {
    %c0 = arith.constant 0 : index
    %c0_0 = arith.constant 0 : index
    %0 = vector.load %arg1[%c0, %c0_0] : memref<2x32xf32, #tpu.memory_space<vmem>>, vector<2x32xf32>
    %1 = arith.truncf %0 : vector<2x32xf32> to vector<2x32xbf16>
    %c0_1 = arith.constant 0 : index
    %c0_2 = arith.constant 0 : index
    %2 = vector.load %arg2[%c0_1, %c0_2] : memref<128x32xbf16, #tpu.memory_space<vmem>>, vector<128x32xbf16>
    %cst = arith.constant dense<0.000000e+00> : vector<2x128xf32>
    %3 = tpu.matmul %1, %2, %cst {dimension_numbers = #tpu.dot_dimension_numbers<[1], [1], [0], [0], [0, 0, 1, 0], [], []>} : vector<2x32xbf16>, vector<128x32xbf16>, vector<2x128xf32> -> vector<2x128xf32>
    %c0_3 = arith.constant 0 : index
    %c0_4 = arith.constant 0 : index
    %4 = vector.load %arg3[%c0_3, %c0_4] : memref<1x128xf32, #tpu.memory_space<vmem>>, vector<1x128xf32>
    %5 = vector.broadcast %4 : vector<1x128xf32> to vector<2x128xf32>
    %6 = arith.addf %3, %5 : vector<2x128xf32>
    %7 = arith.negf %6 : vector<2x128xf32>
    %8 = math.exp %7 : vector<2x128xf32>
    %cst_5 = arith.constant 1.000000e+00 : f32
    %9 = vector.broadcast %cst_5 : f32 to vector<2x128xf32>
    %10 = arith.addf %9, %8 : vector<2x128xf32>
    %11 = arith.divf %9, %10 : vector<2x128xf32>
    %12 = arith.mulf %6, %11 : vector<2x128xf32>
    %13 = arith.truncf %12 : vector<2x128xf32> to vector<2x128xbf16>
    %c0_6 = arith.constant 0 : index
    %c0_7 = arith.constant 0 : index
    %14 = vector.load %arg4[%c0_6, %c0_7] : memref<128x128xbf16, #tpu.memory_space<vmem>>, vector<128x128xbf16>
    %cst_8 = arith.constant dense<0.000000e+00> : vector<2x128xf32>
    %15 = tpu.matmul %13, %14, %cst_8 {dimension_numbers = #tpu.dot_dimension_numbers<[1], [1], [0], [0], [0, 0, 1, 0], [], []>} : vector<2x128xbf16>, vector<128x128xbf16>, vector<2x128xf32> -> vector<2x128xf32>
    %c0_9 = arith.constant 0 : index
    %c0_10 = arith.constant 0 : index
    %16 = vector.load %arg5[%c0_9, %c0_10] : memref<1x128xf32, #tpu.memory_space<vmem>>, vector<1x128xf32>
    %17 = vector.broadcast %16 : vector<1x128xf32> to vector<2x128xf32>
    %18 = arith.addf %15, %17 : vector<2x128xf32>
    %c0_11 = arith.constant 0 : index
    %c0_12 = arith.constant 0 : index
    %19 = vector.load %arg6[%c0_11, %c0_12] : memref<2x128xf32, #tpu.memory_space<vmem>>, vector<2x128xf32>
    tpu.vector_store %arg6[%c0_11, %c0_12], %18 {strides = array<i32>} : memref<2x128xf32, #tpu.memory_space<vmem>>, vector<2x128xf32>,
    return
  }
  func.func @transform_0(%arg0: i32) -> (i32, i32) {
    %c0_i32 = arith.constant 0 : i32
    %c0_i32_0 = arith.constant 0 : i32
    %c0_i32_1 = arith.constant 0 : i32
    return %c0_i32, %c0_i32_0 : i32, i32
  }
  func.func @transform_1(%arg0: i32) -> (i32, i32) {
    %c0_i32 = arith.constant 0 : i32
    %c0_i32_0 = arith.constant 0 : i32
    %c0_i32_1 = arith.constant 0 : i32
    return %c0_i32, %c0_i32_0 : i32, i32
  }
  func.func @transform_2(%arg0: i32) -> (i32, i32) {
    %c0_i32 = arith.constant 0 : i32
    %c0_i32_0 = arith.constant 0 : i32
    %c0_i32_1 = arith.constant 0 : i32
    return %c0_i32, %c0_i32_0 : i32, i32
  }
  func.func @transform_3(%arg0: i32) -> (i32, i32) {
    %c0_i32 = arith.constant 0 : i32
    %c0_i32_0 = arith.constant 0 : i32
    return %arg0, %c0_i32 : i32, i32
  }
  func.func @transform_4(%arg0: i32) -> (i32, i32) {
    %c0_i32 = arith.constant 0 : i32
    %c0_i32_0 = arith.constant 0 : i32
    return %c0_i32, %arg0 : i32, i32
  }
  func.func @transform_5(%arg0: i32) -> (i32, i32) {
    %c0_i32 = arith.constant 0 : i32
    %c0_i32_0 = arith.constant 0 : i32
    return %c0_i32, %arg0 : i32, i32
  }
}

</mosaic_0001>

<bundles_post_ra>
// kernel: tpu_custom_call.1
= control target key start
LH: loop header
LB: loop body
LE: loop exit
PB: predicated region body
PF: predicated region fallthrough
CT: control target
= control target key end

     0   :  { %vm83_vm0 = vcmask 261120   ;;  %s458_s0 = inlined_call_operand.vmem [shape: f32[2,32], index: 0, kind: input, shape index: {}]   ;;  %s459_s1 = inlined_call_operand.vmem [shape: bf16[128,32], index: 1, kind: input, shape index: {}]   ;;  %s460_s2 = inlined_call_operand.vmem [shape: f32[1,128], index: 2, kind: input, shape index: {}]   ;;  %s461_s3 = inlined_call_operand.vmem [shape: bf16[128,128], index: 3, kind: input, shape index: {}]   ;;  %s462_s4 = inlined_call_operand.vmem [shape: f32[1,128], index: 4, kind: input, shape index: {}]   ;;  %s463_s5 = inlined_call_operand.hbm [shape: f32[2,128], index: 5, kind: output, shape index: {}]  }
   0x1   :  { %v316_v0 = vld [vmem:[%s459_s1 + $0x38] sm:$0xff] }
   0x2   :  { %v109_v1 = vsel %vm83_vm0, %v316_v0, 0 }
   0x3   :  { %111 = vmatpush.bf16.xpose.msra.mxu0 %v109_v1 }
   0x4   :  { %10 = vsyncpa [#allocation3], 0  ;;  %v315_v2 = vld [vmem:[%s459_s1 + $0x30] sm:$0xff]  ;;  %v314_v4 = vld [vmem:[%s459_s1 + $0x28] sm:$0xff]  ;;  %s358_s27 = smov [#allocation2]   ;;  %s234_s6 = sshll.u32 %s463_s5, 4  ;;  %s235_s6 = int_to_ptr.hbm [resolvable:$true] %s234_s6 }
   0x5   :  { %v106_v3 = vsel %vm83_vm0, %v315_v2, 0  ;;  %v103_v5 = vsel %vm83_vm0, %v314_v4, 0  ;;  %v313_v6 = vld [vmem:[%s459_s1 + $0x20] sm:$0xff]  ;;  %v312_v8 = vld [vmem:[%s459_s1 + $0x18] sm:$0xff]  ;;  %v311_v11 = vld [vmem:[%s459_s1 + $0x10] sm:$0xff]  ;;  %s232_s28 = sshll.u32 %s358_s27, 4  ;;  %s233_s28 = int_to_ptr.vmem [resolvable:$true] %s232_s28 }
   0x6   :  { %v100_v7 = vsel %vm83_vm0, %v313_v6, 0  ;;  %v97_v9 = vsel %vm83_vm0, %v312_v8, 0  ;;  %v324_v10 = vld [vmem:[%s461_s3 + $0x38] sm:$0xff]  ;;  %v94_v12 = vsel %vm83_vm0, %v311_v11, 0  ;;  %v323_v13 = vld [vmem:[%s461_s3 + $0x30] sm:$0xff]  ;;  %v310_v14 = vld [vmem:[%s459_s1 + $0x8] sm:$0xff] }
   0x7   :  { %213 = vmatpush.bf16.xpose.msra.mxu1 %v324_v10  ;;  %v91_v15 = vsel %vm83_vm0, %v310_v14, 0  ;;  %v322_v16 = vld [vmem:[%s461_s3 + $0x28] sm:$0xff]  ;;  %v309_v17 = vld [vmem:[%s459_s1] sm:$0xff]  ;;  %v320_v22 = vld [vmem:[%s461_s3 + $0x18] sm:$0xff] }
   0x8   :  { %v88_v18 = vsel %vm83_vm0, %v309_v17, 0  ;;  %v321_v19 = vld [vmem:[%s461_s3 + $0x20] sm:$0xff]  ;;  %v319_v23 = vld [vmem:[%s461_s3 + $0x10] sm:$0xff]  ;;  %v318_v24 = vld [vmem:[%s461_s3 + $0x8] sm:$0xff] }
   0x9   :  { %v21_v20 = vld [vmem:[%s458_s0] sm:$0x3] }
   0xa   :  { %v22_v21 = vpack.c.bf16 %v21_v20, %v21_v20  ;;  %v317_v25 = vld [vmem:[%s461_s3] sm:$0xff] }
   0xb   :  { %112 = vmatpush.bf16.xpose.msra.mxu0 %v106_v3  ;;  %v326_v26 = vld [vmem:[%s460_s2] ss:$0 sm:$0xff] }
   0xc   :  { %v327_v45 = vld [vmem:[%s462_s4] ss:$0 sm:$0xff] }
   0xf   :  { %214 = vmatpush.bf16.xpose.msra.mxu1 %v323_v13 }
  0x13   :  { %113 = vmatpush.bf16.xpose.msra.mxu0 %v103_v5 }
  0x17   :  { %215 = vmatpush.bf16.xpose.msra.mxu1 %v322_v16 }
  0x1b   :  { %114 = vmatpush.bf16.xpose.msra.mxu0 %v100_v7 }
  0x1f   :  { %216 = vmatpush.bf16.xpose.msra.mxu1 %v321_v19 }
  0x23   :  { %115 = vmatpush.bf16.xpose.msra.mxu0 %v97_v9 }
  0x27   :  { %217 = vmatpush.bf16.xpose.msra.mxu1 %v320_v22 }
  0x2b   :  { %116 = vmatpush.bf16.xpose.msra.mxu0 %v94_v12 }
  0x2f   :  { %218 = vmatpush.bf16.xpose.msra.mxu1 %v319_v23 }
  0x33   :  { %117 = vmatpush.bf16.xpose.msra.mxu0 %v91_v15 }
  0x37   :  { %219 = vmatpush.bf16.xpose.msra.mxu1 %v318_v24 }
  0x3b   :  { %118 = vmatpush.bf16.xpose.msra.mxu0 %v88_v18 }
  0x3f   :  { %220 = vmatpush.bf16.xpose.msra.mxu1 %v317_v25 }
  0x42   :  { %275 = vmatmul.msk.bf16.vlgmr.msra.gmra.mxu0 %vm83_vm0, %v22_v21 }
  0xbf   :  { %v120_v27 = vpop.f32.mrf.mxu0 }
  0xc0   :  { %v121_v28 = vadd.f32 %v326_v26, %v120_v27 }
  0xc2   :  { %v276_v29 = vmul.f32 -1.442695, %v121_v28 }
  0xc4   :  { %328 = vpow2.f32 %v276_v29 }
  0xc7   :  { %v122_v30 = vpop.f32.mrf.mxu0 }
  0xca   :  { %v329_v31 = vpop.eup %328 }
  0xcb   :  { %v127_v32 = vadd.f32 1.0, %v329_v31 }
  0xcd   :  { %330 = vrcp.f32 %v127_v32  ;;  %v139_v36 = vand.u32 2147483648, %v127_v32  ;;  %v137_v38 = vand.u32 2147483647, %v127_v32  ;;  %vm133_vm2 = vweird.f32 %v127_v32 }
  0xcf   :  { %v140_v40 = vor.u32 1.1754944e-38, %v139_v36  ;;  %vm138_vm4 = vcmp.eq.f32.partialorder %v137_v38, 8.507059e+37 }
  0xd3   :  { %v331_v33 = vpop.eup %330 }
  0xd4   :  { %v129_v34 = vmul.f32 %v331_v33, %v127_v32  ;;  %vm134_vm1 = vweird.f32 %v331_v33 }
  0xd5   :  { %vm135_vm3 = vmor %vm133_vm2, %vm134_vm1 }
  0xd6   :  { %v130_v35 = vsub.f32 1.0, %v129_v34 }
  0xd8   :  { %v131_v37 = vmul.f32 %v331_v33, %v130_v35 }
  0xda   :  { %v132_v39 = vadd.f32 %v331_v33, %v131_v37 }
  0xdc   :  { %v136_v41 = vsel %vm135_vm3, %v331_v33, %v132_v39 }
  0xdd   :  { %v141_v42 = vsel %vm138_vm4, %v140_v40, %v136_v41 }
  0xde   :  { %v143_v43 = vmul.f32 %v141_v42, %v121_v28 }
  0xe0   :  { %v144_v44 = vpack.c.bf16 %v143_v43, %v143_v43 }
  0xe2   :  { %221 = vmatmul.bf16.vlgmr.msra.gmra.mxu1 %v144_v44 }
 0x15f   :  { %v222_v46 = vpop.f32.mrf.mxu1 }
 0x160   :  { %v223_v47 = vadd.f32 %v327_v45, %v222_v46 }
 0x162   :  { %226 = vst [vmem:[#allocation2] sm:$0x3] %v223_v47 }
 0x163   :  { %237 = dma.vmem_to_hbm [thread:$0]  %s233_s28, 32, %s235_s6, [#allocation3]  }
 0x167   :  { %v224_v48 = vpop.f32.mrf.mxu1 }
 0x168   :  { %356 = dma.done.wait [#allocation3], 32  }
 0x169   :  { %357 = vsyncadd [#allocation3], 4294967264 }
 0x16a   :  { %242 = vsyncpa [#allocation3], 1 }

</bundles_post_ra>
